<compile_context>
chip_gen: v5e
topology: v5e:2x2
jax: 0.10.0
libtpu: 0.0.40
codegen_flags: <defaults>
</compile_context>

<pallas_src>
import numpy as np
import jax
import jax.numpy as jnp
from jax.experimental import pallas as pl
from jax.experimental.pallas import tpu as pltpu

N_QUBITS = 2
N_DEPTH = 1
N_LAYERS = 1
IN_DIM = 2
DIM = 2 ** N_QUBITS  # statevector length = 4


# ---------------- host-side construction of the fixed circuit algebra ----------------
def _rz(phi):
    return np.array([[np.exp(-0.5j * phi), 0.0], [0.0, np.exp(0.5j * phi)]],
                    dtype=np.complex128)


def _ry(theta):
    c, s = np.cos(theta / 2.0), np.sin(theta / 2.0)
    return np.array([[c, -s], [s, c]], dtype=np.complex128)


def _rot(phi, theta, omega):
    # qml.Rot(phi, theta, omega) = RZ(omega) RY(theta) RZ(phi)
    return _rz(omega) @ _ry(theta) @ _rz(phi)


def _rx(theta):
    c, s = np.cos(theta / 2.0), np.sin(theta / 2.0)
    return np.array([[c, -1j * s], [-1j * s, c]], dtype=np.complex128)


# wire 0 = MSB of the basis index (PennyLane convention)
# CNOT(control=0, target=1): swap basis 2<->3 ; CNOT(control=1, target=0): swap 1<->3
_CNOT01 = np.eye(DIM, dtype=np.complex128)[[0, 1, 3, 2]]
_CNOT10 = np.eye(DIM, dtype=np.complex128)[[0, 3, 2, 1]]


def _sel_unitary(w_block):
    # StronglyEntanglingLayers on 2 wires: per layer Rot on each wire, then CNOT(0,1), CNOT(1,0)
    U = np.eye(DIM, dtype=np.complex128)
    for l in range(w_block.shape[0]):
        r0 = _rot(*np.asarray(w_block[l, 0], dtype=np.float64))
        r1 = _rot(*np.asarray(w_block[l, 1], dtype=np.float64))
        layer = _CNOT10 @ _CNOT01 @ np.kron(r0, r1)
        U = layer @ U
    return U


def build_constants(w_q, W_lin, b_lin):
    """Fold circuit + Z-signs + Linear head into K (3x3), bias folded into K[0,0].

    With c_j = cos(x_j/2), s_j = sin(x_j/2):
      psi = sum_t T_t A_t,  T = [c0c1, c0s1, s0c1, s0s1]   (A_t precomputed complex 4-vecs)
      out = sum_i g_i |psi_i|^2 + b = T^T M T + b           (M real 4x4)
    T is a tensor product of [c0,s0] and [c1,s1]; via half-angle identities the
    quadratic form collapses to   out = v0^T K v1,  v_j = [1, cos x_j, sin x_j].
    """
    U1 = _sel_unitary(w_q[0])
    U2 = _sel_unitary(w_q[1])
    e0 = np.zeros(DIM, dtype=np.complex128)
    e0[0] = 1.0
    phi = U1 @ e0  # state after SEL(w0) on |00>

    X = np.array([[0.0, 1.0], [1.0, 0.0]], dtype=np.complex128)
    I2 = np.eye(2, dtype=np.complex128)
    paulis = [np.kron(I2, I2), np.kron(I2, X), np.kron(X, I2), np.kron(X, X)]
    coefs = [1.0, -1.0j, -1.0j, -1.0]
    A = np.stack([coefs[t] * (U2 @ (paulis[t] @ phi)) for t in range(4)])  # (4 terms, 4 states)

    z0sign = np.array([1.0, 1.0, -1.0, -1.0])
    z1sign = np.array([1.0, -1.0, 1.0, -1.0])
    g = float(W_lin[0, 0]) * z0sign + float(W_lin[0, 1]) * z1sign

    # M[t,t'] = sum_i g_i Re(A_ti conj(A_t'i))
    M = np.real(np.einsum('i,ti,ui->tu', g, A, A.conj()))
    # t = 2a+b with u0=[c0,s0], u1=[c1,s1]  ->  N[(a,a'),(b,b')]
    N = M.reshape(2, 2, 2, 2).transpose(0, 2, 1, 3).reshape(4, 4)
    # pair monomials [c^2, cs, sc, s^2] -> [1, cos x, sin x]  (half-angle identities)
    Lm = np.array([[0.5, 0.5, 0.0],
                   [0.0, 0.0, 0.5],
                   [0.0, 0.0, 0.5],
                   [0.5, -0.5, 0.0]])
    K = Lm.T @ N @ Lm                     # 3x3
    K[0, 0] += float(b_lin[0])            # fold bias into the constant term
    return jnp.asarray(K.ravel().astype(np.float32))  # f32[9]


# --------------------------------- Pallas kernel -------------------------------------
def qscalar_kernel(k_ref, x0_ref, x1_ref, out_ref):
    # k_ref:   SMEM f32[9]  row-major K (bias folded into k[0]) -- scalar-broadcast reads
    # x0_ref:  VMEM (sb, L) dense angle tile (batch packed sublane x lane)
    # x1_ref:  VMEM (sb, L)
    # out_ref: VMEM (sb, L) dense output tile (unmasked stores)
    x0 = x0_ref[...]
    x1 = x1_ref[...]
    c0 = jnp.cos(x0)
    s0 = jnp.sin(x0)
    c1 = jnp.cos(x1)
    s1 = jnp.sin(x1)
    r0 = k_ref[0] + k_ref[1] * c1 + k_ref[2] * s1
    r1 = k_ref[3] + k_ref[4] * c1 + k_ref[5] * s1
    r2 = k_ref[6] + k_ref[7] * c1 + k_ref[8] * s1
    out_ref[...] = r0 + c0 * r1 + s0 * r2


# --------------------------------- wrapper -------------------------------------------
def _plan_tiles(B):
    """Pick (lanes, sublanes-per-block, grid-steps) for a dense 2-D batch layout.

    Blocks are (sb, L) f32 with sb % 8 == 0 and L % 128 == 0, capped at (256, 512)
    (~512 KiB per buffer -> low-MiB VMEM footprint, fine on v5e/v6e/v7x defaults),
    and the grid always has >= 2 steps so both TensorCores are used on v7x.
    Small batches pad up to 2*(8*128) elements, which is negligible work.
    """
    L = 512 if B >= 2 * 8 * 512 else 128
    rows = max(1, -(-B // L))
    sb = 8
    while sb * 2 <= 256 and rows >= sb * 4:
        sb *= 2
    steps = max(2, -(-rows // sb))
    return L, sb, steps


def qscalar_forward(x, k_const):
    # torch glue: x.view(-1, in_dim).repeat(1, n_qubits*n_depth//in_dim)
    x2 = x.reshape(-1, IN_DIM).astype(jnp.float32)
    rep = (N_QUBITS * N_DEPTH) // IN_DIM
    if rep > 1:
        x2 = jnp.tile(x2, (1, rep))
    B = x2.shape[0]

    L, sb, steps = _plan_tiles(B)
    n_pad = steps * sb * L

    # Two dense (rows, lanes) angle slabs: no standalone transpose, every block is a
    # full (sb, L) tile (fully packed vregs, unmasked vst). Pad tail with zeros.
    x0 = x2[:, 0]
    x1 = x2[:, 1]
    if n_pad != B:
        x0 = jnp.pad(x0, (0, n_pad - B))
        x1 = jnp.pad(x1, (0, n_pad - B))
    x0 = x0.reshape(steps * sb, L)
    x1 = x1.reshape(steps * sb, L)

    out = pl.pallas_call(
        qscalar_kernel,
        out_shape=jax.ShapeDtypeStruct((steps * sb, L), jnp.float32),
        grid=(steps,),
        in_specs=[
            pl.BlockSpec(memory_space=pltpu.MemorySpace.SMEM),   # 9 packed constants
            pl.BlockSpec((sb, L), lambda i: (i, 0)),             # x0 tile
            pl.BlockSpec((sb, L), lambda i: (i, 0)),             # x1 tile
        ],
        out_specs=pl.BlockSpec((sb, L), lambda i: (i, 0)),       # dense output tile
        compiler_params=pltpu.CompilerParams(
            dimension_semantics=("parallel",)),
        cost_estimate=pl.CostEstimate(
            flops=16 * n_pad, transcendentals=4 * n_pad, bytes_accessed=12 * n_pad),
    )(k_const, x0, x1)

    return out.reshape(-1)[:B].reshape(B, 1)


# ------------------------------ numpy reference ---------------------------------------
def reference_forward(x_np, w_q, W_lin, b_lin):
    x2 = x_np.reshape(-1, IN_DIM)
    rep = (N_QUBITS * N_DEPTH) // IN_DIM
    x2 = np.tile(x2, (1, rep))
    U1 = _sel_unitary(w_q[0])
    U2 = _sel_unitary(w_q[1])
    e0 = np.zeros(DIM, dtype=np.complex128)
    e0[0] = 1.0
    outs = []
    for row in x2:
        state = U1 @ e0
        state = np.kron(_rx(row[0]), _rx(row[1])) @ state
        state = U2 @ state
        p = np.abs(state) ** 2
        z0 = p[0] + p[1] - p[2] - p[3]
        z1 = p[0] - p[1] + p[2] - p[3]
        outs.append(np.array([z0, z1], dtype=np.float64) @ W_lin[0] + b_lin[0])
    return np.array(outs, dtype=np.float32).reshape(-1, 1)


# ------------------------------------ main ---------------------------------------------
if __name__ == "__main__":
    key = jax.random.PRNGKey(0)
    k_x, k_wq, k_wl, k_bl = jax.random.split(key, 4)

    # deterministic parameter init (shapes from QScalar.__init__)
    w_q = np.asarray(jax.random.uniform(
        k_wq, (N_DEPTH + 1, N_LAYERS, N_QUBITS, 3), minval=0.0, maxval=2.0 * np.pi))
    bound = 1.0 / np.sqrt(N_QUBITS)
    W_lin = np.asarray(jax.random.uniform(k_wl, (1, N_QUBITS), minval=-bound, maxval=bound),
                       dtype=np.float32)
    b_lin = np.asarray(jax.random.uniform(k_bl, (1,), minval=-bound, maxval=bound),
                       dtype=np.float32)

    k_const = build_constants(w_q, W_lin, b_lin)

    # example input: batch=8, in_dim=2  (forward views to (-1, in_dim))
    x = jax.random.normal(k_x, (8, IN_DIM), dtype=jnp.float32)

    out = qscalar_forward(x, k_const)
    out = jax.block_until_ready(out)

    ref = reference_forward(np.asarray(x), w_q, W_lin, b_lin)
    np.testing.assert_allclose(np.asarray(out), ref, rtol=1e-4, atol=1e-4)
    print("KERNEL_OK")
</pallas_src>

<mosaic_0001>
module attributes {stable_mosaic.version = 11 : i64} {
  func.func @qscalar_kernel(%arg0: i32, %arg1: memref<9xf32, #tpu.memory_space<smem>>, %arg2: memref<8x128xf32, #tpu.memory_space<vmem>>, %arg3: memref<8x128xf32, #tpu.memory_space<vmem>>, %arg4: memref<8x128xf32, #tpu.memory_space<vmem>>) attributes {dimension_semantics = [#tpu.dimension_semantics<parallel>], iteration_bounds = array<i64: 2>, scalar_prefetch = 0 : i64, scratch_operands = 0 : i64, tpu.core_type = #tpu.core_type<tc>, window_params = [{transform_indices = @transform_0, window_bounds = array<i64: 9>}, {transform_indices = @transform_1, window_bounds = array<i64: 8, 128>}, {transform_indices = @transform_2, window_bounds = array<i64: 8, 128>}, {transform_indices = @transform_3, window_bounds = array<i64: 8, 128>}]} {
    %c0 = arith.constant 0 : index
    %c0_0 = arith.constant 0 : index
    %0 = vector.load %arg2[%c0, %c0_0] : memref<8x128xf32, #tpu.memory_space<vmem>>, vector<8x128xf32>
    %c0_1 = arith.constant 0 : index
    %c0_2 = arith.constant 0 : index
    %1 = vector.load %arg3[%c0_1, %c0_2] : memref<8x128xf32, #tpu.memory_space<vmem>>, vector<8x128xf32>
    %2 = math.cos %0 : vector<8x128xf32>
    %3 = math.sin %0 : vector<8x128xf32>
    %4 = math.cos %1 : vector<8x128xf32>
    %5 = math.sin %1 : vector<8x128xf32>
    %c0_3 = arith.constant 0 : index
    %6 = memref.load %arg1[%c0_3] : memref<9xf32, #tpu.memory_space<smem>>
    %c1 = arith.constant 1 : index
    %7 = memref.load %arg1[%c1] : memref<9xf32, #tpu.memory_space<smem>>
    %8 = vector.broadcast %7 : f32 to vector<8x128xf32>
    %9 = arith.mulf %8, %4 : vector<8x128xf32>
    %10 = vector.broadcast %6 : f32 to vector<8x128xf32>
    %11 = arith.addf %10, %9 : vector<8x128xf32>
    %c2 = arith.constant 2 : index
    %12 = memref.load %arg1[%c2] : memref<9xf32, #tpu.memory_space<smem>>
    %13 = vector.broadcast %12 : f32 to vector<8x128xf32>
    %14 = arith.mulf %13, %5 : vector<8x128xf32>
    %15 = arith.addf %11, %14 : vector<8x128xf32>
    %c3 = arith.constant 3 : index
    %16 = memref.load %arg1[%c3] : memref<9xf32, #tpu.memory_space<smem>>
    %c4 = arith.constant 4 : index
    %17 = memref.load %arg1[%c4] : memref<9xf32, #tpu.memory_space<smem>>
    %18 = vector.broadcast %17 : f32 to vector<8x128xf32>
    %19 = arith.mulf %18, %4 : vector<8x128xf32>
    %20 = vector.broadcast %16 : f32 to vector<8x128xf32>
    %21 = arith.addf %20, %19 : vector<8x128xf32>
    %c5 = arith.constant 5 : index
    %22 = memref.load %arg1[%c5] : memref<9xf32, #tpu.memory_space<smem>>
    %23 = vector.broadcast %22 : f32 to vector<8x128xf32>
    %24 = arith.mulf %23, %5 : vector<8x128xf32>
    %25 = arith.addf %21, %24 : vector<8x128xf32>
    %c6 = arith.constant 6 : index
    %26 = memref.load %arg1[%c6] : memref<9xf32, #tpu.memory_space<smem>>
    %c7 = arith.constant 7 : index
    %27 = memref.load %arg1[%c7] : memref<9xf32, #tpu.memory_space<smem>>
    %28 = vector.broadcast %27 : f32 to vector<8x128xf32>
    %29 = arith.mulf %28, %4 : vector<8x128xf32>
    %30 = vector.broadcast %26 : f32 to vector<8x128xf32>
    %31 = arith.addf %30, %29 : vector<8x128xf32>
    %c8 = arith.constant 8 : index
    %32 = memref.load %arg1[%c8] : memref<9xf32, #tpu.memory_space<smem>>
    %33 = vector.broadcast %32 : f32 to vector<8x128xf32>
    %34 = arith.mulf %33, %5 : vector<8x128xf32>
    %35 = arith.addf %31, %34 : vector<8x128xf32>
    %36 = arith.mulf %2, %25 : vector<8x128xf32>
    %37 = arith.addf %15, %36 : vector<8x128xf32>
    %38 = arith.mulf %3, %35 : vector<8x128xf32>
    %39 = arith.addf %37, %38 : vector<8x128xf32>
    %c0_4 = arith.constant 0 : index
    %c0_5 = arith.constant 0 : index
    %40 = vector.load %arg4[%c0_4, %c0_5] : memref<8x128xf32, #tpu.memory_space<vmem>>, vector<8x128xf32>
    tpu.vector_store %arg4[%c0_4, %c0_5], %39 {strides = array<i32>} : memref<8x128xf32, #tpu.memory_space<vmem>>, vector<8x128xf32>,
    return
  }
  func.func @transform_0(%arg0: i32) -> i32 {
    %c0_i32 = arith.constant 0 : i32
    %c0_i32_0 = arith.constant 0 : i32
    return %c0_i32 : i32
  }
  func.func @transform_1(%arg0: i32) -> (i32, i32) {
    %c0_i32 = arith.constant 0 : i32
    %c0_i32_0 = arith.constant 0 : i32
    return %arg0, %c0_i32 : i32, i32
  }
  func.func @transform_2(%arg0: i32) -> (i32, i32) {
    %c0_i32 = arith.constant 0 : i32
    %c0_i32_0 = arith.constant 0 : i32
    return %arg0, %c0_i32 : i32, i32
  }
  func.func @transform_3(%arg0: i32) -> (i32, i32) {
    %c0_i32 = arith.constant 0 : i32
    %c0_i32_0 = arith.constant 0 : i32
    return %arg0, %c0_i32 : i32, i32
  }
}

</mosaic_0001>

<bundles_post_ra>
// kernel: tpu_custom_call.1
= control target key start
LH: loop header
LB: loop body
LE: loop exit
PB: predicated region body
PF: predicated region fallthrough
CT: control target
= control target key end

     0   :  { %s1655_s0 = inlined_call_operand.hbm [shape: f32[9], index: 0, kind: input, shape index: {}]   ;;  %s1656_s1 = inlined_call_operand.hbm [shape: f32[16,128], index: 1, kind: input, shape index: {}]   ;;  %s1657_s2 = inlined_call_operand.hbm [shape: f32[16,128], index: 2, kind: input, shape index: {}]   ;;  %s1658_s3 = inlined_call_operand.hbm [shape: f32[16,128], index: 3, kind: output, shape index: {}]  }
   0x1   :  { %1659 = sst [smem:[#allocation14_spill]] %s1655_s0 }
   0x2   :  { %8 = vsyncpa [#allocation5], 0 }
   0x3   :  { %9 = vsyncpa [#allocation3], 0 }
   0x4   :  { %11 = vsyncpa [#allocation3 + $0x1], 0 }
   0x5   :  { %12 = vsyncpa [#allocation8], 0 }
   0x6   :  { %14 = vsyncpa [#allocation8 + $0x1], 0 }
   0x7   :  { %15 = vsyncpa [#allocation4], 0 }
   0x8   :  { %17 = vsyncpa [#allocation4 + $0x1], 0  ;;  %s1302_s12 = smov 0   ;;  %s1304_s13 = smov 0  }
   0x9   :  { %s1306_s14 = smov 0   ;;  %s1308_s15 = smov 0  }
   0xa LB: > { %s1323_s16 = sadd.s32 4294967295, %s1272_s15   ;;  %s1017_s17 = sadd.s32 4294967294, %s1272_s15   ;;  %s1272_s15 = sphi %s1308_s15, %s1672_s15   ;;  %s1268_s14 = sphi %s1306_s14, %s1671_s14   ;;  %s1264_s13 = sphi %s1304_s13, %s1670_s13   ;;  %s1260_s12 = sphi %s1302_s12, %s1669_s12  }
   0xb   : > { %p64_p0 = scmp.ne.s32.totalorder %s1264_s13, %s1260_s12  ;;  %p65_p1 = scmp.eq.s32.totalorder %s1323_s16, 0 }
   0xc   : > { %p114_p2 = scmp.eq.s32.totalorder %s1323_s16, 1  ;;  %p120_p3 = scmp.eq.s32.totalorder %s1017_s17, 1 }
   0xd   : > { %p1332_p4 = por %p65_p1, %p64_p0  ;;  %p1018_p5 = scmp.ge.s32.totalorder %s1272_s15, 1 }
   0xe   : > { %p1337_p6 = por %p120_p3, %p64_p0  ;;  %p127_p7 = scmp.lt.s32.totalorder %s1272_s15, 3 }
   0xf   : > { %s1662_s0 = sld [smem:[#allocation14_spill]]  ;;  %s1353_s24 = sadd.s32 1, %s1272_s15  }
  0x10   : > { %p1345_p8 = pnand %p1018_p5, %p127_p7  ;;  %s48_s25 = ssub.s32 %s1272_s15, %s1353_s24 }
  0x11   : > { %p49_p12 = scmp.eq.s32.totalorder %s48_s25, 0  ;;  %s51_s26 = sadd.s32 1, %s1268_s14 }
  0x12   : > { %p1064_p10 = pneg %p1345_p8  ;;  %p58_p13 = scmp.ne.s32.totalorder %s1268_s14, %s1264_s13 }
  0x13   : > { %s1274_s27 = smov [#allocation2]   ;;  %p59_p0 = scmp.eq.s32.totalorder %s1272_s15, 0 }
  0x14   : > { %p1065_p11 = pnand %p1064_p10, %p65_p1  ;;  %p1368_p3 = por %p114_p2, %p58_p13 }
  0x15   : > { %s139_s22 = sshll.u32 %s1662_s0, 4  ;;  %p1080_p5 = scmp.lt.s32.totalorder %s1272_s15, 2  ;;  %s140_s22 = int_to_ptr.hbm [resolvable:$true] %s139_s22 }
  0x16   : > { %1067 = dma.hbm_to_smem (!%p1065_p11), %s140_s22, 16, %s1274_s27, [#allocation5]  }
  0x17   : > { %s1363_s28 = scalar_select %p49_p12, %s1268_s14, %s51_s26  }
  0x18   : > { %s1374_s30 = sand.u32 1, %s1268_s14   ;;  %p60_p7 = por %p59_p0, %p58_p13 }
  0x19   : > { %s1021_s4 = sshll.u32 %s1374_s30, 3  ;;  %s1022_s5 = sshll.u32 %s1272_s15, 3 }
  0x1a   : > { %s158_s8 = scalar_lea.hbm %s1656_s1, %s1022_s5  ;;  %s154_s10 = scalar_lea.vmem [#allocation6], %s1021_s4 }
  0x1b   : > { %s160_s9 = sshll.u32 %s158_s8, 4  ;;  %s162_s11 = sshll.u32 %s154_s10, 4  ;;  %s161_s9 = int_to_ptr.hbm [resolvable:$true] %s160_s9  ;;  %s163_s11 = int_to_ptr.vmem [resolvable:$true] %s162_s11 }
  0x1c   : > { %p1381_p2 = pnand %p1080_p5, %p60_p7  ;;  %s177_s22 = scalar_lea.hbm %s1657_s2, %s1022_s5 }
  0x1d   : > { %s179_s25 = sshll.u32 %s177_s22, 4  ;;  %s151_s26 = scalar_lea.sflag [#allocation3], %s1374_s30  ;;  %s180_s25 = int_to_ptr.hbm [resolvable:$true] %s179_s25 }
  0x1e   : > { %s1138_s27 = sshra.s32 %s161_s9, 4  ;;  %p1142_p11 = pneg %p1381_p2  ;;  %s1139_s27 = int_to_ptr.hbm [resolvable:$true] %s1138_s27 }
  0x1f   : > { %s1140_s6 = scalar_lea.hbm %s1139_s27, 8  ;;  %s1145_s10 = scalar_lea.hbm %s1656_s1, 16 }
  0x20   : > { %p1141_p10 = scmp.ne.s32.totalorder %s1139_s27, %s1140_s6  ;;  %p1146_p0 = scmp.lt.s32.totalorder %s1139_s27, %s1656_s1 }
  0x21   : > { %p1147_p5 = scmp.lt.s32.totalorder %s1145_s10, %s1140_s6 }
  0x22   : > { %p1143_p12 = pnand %p1142_p11, %p1141_p10 }
  0x23   : > { %p1148_p7 = por %p1147_p5, %p1146_p0 }
  0x24   : > { %p1144_p13 = pneg %p1143_p12 }
  0x26   : > { %p1149_p9 = pnand %p1148_p7, %p1144_p13 }
  0x28   : > { %1152 = shalt.err (!%p1149_p9)
}
  0x29   : > { %1071 = dma.hbm_to_vmem [thread:$0]  (!%p1381_p2), %s161_s9, 128, %s163_s11, %s151_s26  }
  0x2a   : > { %s173_s5 = scalar_lea.vmem [#allocation7], %s1021_s4  ;;  %s170_s0 = scalar_lea.sflag [#allocation8], %s1374_s30 }
  0x2b   : > { %s181_s22 = sshll.u32 %s173_s5, 4  ;;  %s1168_s7 = sshra.s32 %s180_s25, 4  ;;  %s182_s22 = int_to_ptr.vmem [resolvable:$true] %s181_s22  ;;  %s1169_s7 = int_to_ptr.hbm [resolvable:$true] %s1168_s7 }
  0x2c   : > { %s1170_s8 = scalar_lea.hbm %s1169_s7, 8  ;;  %s1175_s10 = scalar_lea.hbm %s1657_s2, 16 }
  0x2d   : > { %p1171_p10 = scmp.ne.s32.totalorder %s1169_s7, %s1170_s8  ;;  %p1176_p9 = scmp.lt.s32.totalorder %s1169_s7, %s1657_s2 }
  0x2e   : > { %p1177_p13 = scmp.lt.s32.totalorder %s1175_s10, %s1170_s8 }
  0x2f   : > { %p1173_p12 = pnand %p1171_p10, %p1142_p11 }
  0x30   : > { %p1178_p5 = por %p1177_p13, %p1176_p9 }
  0x31   : > { %p1174_p0 = pneg %p1173_p12 }
  0x33   : > { %p1179_p7 = pnand %p1178_p5, %p1174_p0 }
  0x35   : > { %1182 = shalt.err (!%p1179_p7)
}
  0x36   : > { %1074 = dma.hbm_to_vmem [thread:$0]  (!%p1381_p2), %s180_s25, 128, %s182_s22, %s170_s0  }
  0x37   : > { %190 = sbr.rel (%p1345_p8) target bundleno = 198 (0xc6), region = 32 }
  0x3c   : > { %1243 = dma.done.wait (%p65_p1), [#allocation5], 16  }
  0x3d   : > { %1245 = vsyncadd (%p65_p1), [#allocation5], 4294967280  ;;  %s1421_s30 = sand.u32 1, %s1264_s13  }
  0x3e   : > { %s1424_s4 = sshll.u32 %s1421_s30, 3  ;;  %s198_s9 = scalar_lea.sflag [#allocation3], %s1421_s30 }
  0x3f   : > { %s201_s0 = scalar_lea.vmem [#allocation6], %s1424_s4 }
  0x40   : > { %1247 = dma.done.wait (%p1332_p4), %s198_s9, 128  }
  0x41   : > { %1249 = vsyncadd (%p1332_p4), %s198_s9, 4294967168  ;;  %s208_s23 = scalar_lea.sflag [#allocation8], %s1421_s30  ;;  %s211_s11 = scalar_lea.vmem [#allocation7], %s1424_s4 }
  0x42   : > { %1251 = dma.done.wait (%p1332_p4), %s208_s23, 128  }
  0x43   : > { %1253 = vsyncadd (%p1332_p4), %s208_s23, 4294967168 }
  0x44   : > { %217 = sfence }
  0x45   : > { %v1438_v0 = vld [vmem:[%s201_s0] sm:$0xff]  ;;  %v1440_v1 = vld [vmem:[%s211_s11] sm:$0xff]  ;;  %v1275_v21 = vmov 683565275   ;;  %v1276_v23 = vmov 2475754826  }
  0x46   : > { %v243_v2 = vand.u32 2147483647, %v1438_v0  ;;  %v246_v3 = vand.u32 2139095040, %v1438_v0  ;;  %v555_v6 = vand.u32 2139095040, %v1440_v1  ;;  %v552_v7 = vand.u32 2147483647, %v1440_v1 }
  0x47   : > { %v1277_v25 = vmov 2131351028   ;;  %v1278_v27 = vmov 2102212464   ;;  %v1279_v29 = vmov 920167782  }
  0x48   : > { %v247_v4 = vshrl.u32 %v246_v3, 23  ;;  %v250_v5 = vand.u32 8388607, %v243_v2  ;;  %v556_v9 = vshrl.u32 %v555_v6, 23  ;;  %v559_v13 = vand.u32 8388607, %v552_v7 }
  0x49   : > { %v1280_v38 = vmov 1326507024   ;;  %s1576_s18 = sld [smem:[#allocation2]]  ;;  %s1051_s6 = sshll.u32 %s1323_s16, 3 }
  0x4a   : > { %v1030_v8 = vadd.s32 4294967169, %v247_v4  ;;  %v251_v10 = vor.u32 8388608, %v250_v5  ;;  %v1036_v12 = vadd.s32 4294967169, %v556_v9  ;;  %v560_v19 = vor.u32 8388608, %v559_v13  ;;  %s1578_s17 = sld [smem:[#allocation2 + $0x1]]  ;;  %s907_s21 = scalar_lea.hbm %s1658_s3, %s1051_s6 }
  0x4b   : > { %s1580_s25 = sld [smem:[#allocation2 + $0x2]]  ;;  %s240_s16 = scalar_lea.vmem [#allocation9], %s1424_s4 }
  0x4c   : > { %v253_v11 = vadd.s32 1, %v1030_v8  ;;  %v562_v14 = vadd.s32 1, %v1036_v12  ;;  %v1450_v16 = vshll.u32 %v251_v10, 8  ;;  %v1466_v57 = vshll.u32 %v560_v19, 8  ;;  %s1582_s26 = sld [smem:[#allocation2 + $0x3]]  ;;  %s909_s9 = sshll.u32 %s240_s16, 4  ;;  %s910_s9 = int_to_ptr.vmem [resolvable:$true] %s909_s9 }
  0x4d   : > { %s1584_s5 = sld [smem:[#allocation2 + $0x4]]  ;;  %s911_s0 = sshll.u32 %s907_s21, 4  ;;  %s912_s0 = int_to_ptr.hbm [resolvable:$true] %s911_s0 }
  0x4e   : > { %vm254_vm0 = vcmp.gt.s32.totalorder %v253_v11, 0  ;;  %vm563_vm1 = vcmp.gt.s32.totalorder %v562_v14, 0  ;;  %v292_v31 = vand.u32 65535, %v1450_v16  ;;  %v293_v56 = vshrl.u32 %v1450_v16, 16  ;;  %s1586_s22 = sld [smem:[#allocation2 + $0x5]]  ;;  %s897_s23 = scalar_lea.sflag [#allocation4], %s1421_s30 }
  0x4f   : > { %v255_v15 = vsel %vm254_vm0, %v253_v11, 0  ;;  %v564_v32 = vsel %vm563_vm1, %v562_v14, 0  ;;  %s1588_s7 = sld [smem:[#allocation2 + $0x7]]  ;;  %s1212_s11 = sshra.s32 %s912_s0, 4  ;;  %s1213_s11 = int_to_ptr.hbm [resolvable:$true] %s1212_s11 }
  0x50   : > { %v257_v17 = vand.u32 31, %v255_v15  ;;  %v256_v18 = vshrl.u32 %v255_v15, 5  ;;  %v1460_v45 = vand.u32 31, %v564_v32  ;;  %v1473_v61 = vshrl.u32 %v564_v32, 5  ;;  %s1590_s8 = sld [smem:[#allocation2 + $0x8]]  ;;  %p1219_p2 = scmp.lt.s32.totalorder %s1213_s11, %s1658_s3 }
  0x51   : > { %s1593_s27 = sld [smem:[#allocation2 + $0x6]] }
  0x52   : > { %v258_v20 = vsub.s32 32, %v257_v17  ;;  %v260_v22 = vshll.u32 %v1275_v21, %v257_v17  ;;  %v263_v24 = vshll.u32 %v1276_v23, %v257_v17  ;;  %v266_v26 = vshll.u32 %v1277_v25, %v257_v17 }
  0x53   : > { %v269_v28 = vshll.u32 %v1278_v27, %v257_v17  ;;  %v272_v30 = vshll.u32 %v1279_v29, %v257_v17  ;;  %vm275_vm2 = vcmp.lt.s32.totalorder %v256_v18, 1  ;;  %vm276_vm3 = vcmp.lt.s32.totalorder %v256_v18, 2 }
  0x54   : > { %v259_v33 = vshrl.u32 %v1275_v21, %v258_v20  ;;  %v261_v34 = vshrl.u32 %v1276_v23, %v258_v20  ;;  %v264_v35 = vshrl.u32 %v1277_v25, %v258_v20  ;;  %v267_v36 = vshrl.u32 %v1278_v27, %v258_v20 }
  0x55   : > { %v270_v37 = vshrl.u32 %v1279_v29, %v258_v20  ;;  %v273_v39 = vshrl.u32 %v1280_v38, %v258_v20  ;;  %vm278_vm4 = vcmp.lt.s32.totalorder %v256_v18, 4  ;;  %vm277_vm5 = vcmp.lt.s32.totalorder %v256_v18, 3 }
  0x56   : > { %v262_v40 = vor.u32 %v261_v34, %v260_v22  ;;  %v265_v41 = vor.u32 %v264_v35, %v263_v24  ;;  %v268_v42 = vor.u32 %v267_v36, %v266_v26  ;;  %v1463_v53 = vsub.s32 32, %v1460_v45 }
  0x57   : > { %v271_v43 = vor.u32 %v270_v37, %v269_v28  ;;  %v274_v44 = vor.u32 %v273_v39, %v272_v30  ;;  %v569_v5 = vshll.u32 %v1275_v21, %v1460_v45  ;;  %v572_v8 = vshll.u32 %v1276_v23, %v1460_v45 }
  0x58   : > { %v279_v46 = vsel %vm275_vm2, %v259_v33, %v262_v40  ;;  %v280_v47 = vsel %vm278_vm4, %v268_v42, 2102212464  ;;  %v283_v48 = vsel %vm275_vm2, %v262_v40, %v265_v41  ;;  %v287_v49 = vsel %vm275_vm2, %v265_v41, %v268_v42 }
  0x59   : > { %v281_v50 = vsel %vm277_vm5, %v265_v41, %v280_v47  ;;  %v284_v51 = vsel %vm278_vm4, %v271_v43, 920167782  ;;  %v288_v52 = vsel %vm278_vm4, %v274_v44, 1326507024  ;;  %v570_v6 = vshrl.u32 %v1276_v23, %v1463_v53 }
  0x5a   : > { %v285_v54 = vsel %vm277_vm5, %v268_v42, %v284_v51  ;;  %v289_v55 = vsel %vm277_vm5, %v271_v43, %v288_v52  ;;  %v1469_v58 = vsel %vm276_vm3, %v279_v46, %v281_v50  ;;  %v573_v9 = vshrl.u32 %v1277_v25, %v1463_v53 }
  0x5b   : > { %v286_v59 = vsel %vm276_vm3, %v283_v48, %v285_v54  ;;  %v290_v60 = vsel %vm276_vm3, %v287_v49, %v289_v55  ;;  %v575_v13 = vshll.u32 %v1277_v25, %v1460_v45  ;;  %v1481_v34 = vor.u32 %v570_v6, %v569_v5 }
  0x5c   : > { %v294_v62 = vand.u32 65535, %v290_v60  ;;  %v295_v63 = vshrl.u32 %v290_v60, 16  ;;  %v316_v3 = vand.u32 65535, %v286_v59  ;;  %v317_v4 = vshrl.u32 %v286_v59, 16 }
  0x5d   : > { %v1281_v35 = vmov 0   ;;  %v578_v40 = vshll.u32 %v1278_v27, %v1460_v45  ;;  %v1490_v43 = vor.u32 %v573_v9, %v572_v8  ;;  %v579_v48 = vshrl.u32 %v1279_v29, %v1463_v53 }
  0x5e   : > { %v296_v10 = vmul.u32 %v294_v62, %v292_v31  ;;  %v297_v11 = vmul.u32 %v295_v63, %v292_v31  ;;  %v298_v12 = vmul.u32 %v294_v62, %v293_v56  ;;  %v299_v14 = vmul.u32 %v295_v63, %v293_v56 }
  0x5f   : > { %v318_v15 = vmul.u32 %v316_v3, %v292_v31  ;;  %v319_v17 = vmul.u32 %v317_v4, %v292_v31  ;;  %v320_v18 = vmul.u32 %v316_v3, %v293_v56  ;;  %v321_v24 = vmul.u32 %v317_v4, %v293_v56 }
  0x60   : > { %v300_v19 = vshll.u32 %v297_v11, 16  ;;  %v301_v20 = vshrl.u32 %v297_v11, 16  ;;  %v302_v22 = vshll.u32 %v298_v12, 16  ;;  %v303_v26 = vshrl.u32 %v298_v12, 16 }
  0x61   : > { %v322_v28 = vshll.u32 %v319_v17, 16  ;;  %v323_v30 = vshrl.u32 %v319_v17, 16  ;;  %v324_v32 = vshll.u32 %v320_v18, 16  ;;  %v325_v33 = vshrl.u32 %v320_v18, 16 }
  0x62   : > { %vm304_vm6 = vc.u32 %v296_v10, %v300_v19  ;;  %v306_v23 = vadd.s32 %v300_v19, %v296_v10  ;;  %v576_v31 = vshrl.u32 %v1278_v27, %v1463_v53  ;;  %v581_v50 = vshll.u32 %v1279_v29, %v1460_v45 }
  0x63   : > { %v305_v25 = vsel %vm304_vm6, 1, %v1281_v35  ;;  %vm326_vm7 = vc.u32 %v318_v15, %v322_v28  ;;  %v328_v36 = vadd.s32 %v322_v28, %v318_v15  ;;  %v582_v27 = vshrl.u32 %v1280_v38, %v1463_v53 }
  0x64   : > { %v307_v37 = vadd.s32 %v305_v25, %v299_v14  ;;  %vm308_vm8 = vc.u32 %v306_v23, %v302_v22  ;;  %v327_v39 = vsel %vm326_vm7, 1, %v1281_v35  ;;  %v577_v47 = vor.u32 %v576_v31, %v575_v13 }
  0x65   : > { %v309_v41 = vsel %vm308_vm8, 1, %v1281_v35  ;;  %v329_v42 = vadd.s32 %v327_v39, %v321_v24  ;;  %vm330_vm9 = vc.u32 %v328_v36, %v324_v32  ;;  %vm584_vm10 = vcmp.lt.s32.totalorder %v1473_v61, 1 }
  0x66   : > { %v311_v44 = vadd.s32 %v309_v41, %v307_v37  ;;  %v331_v46 = vsel %vm330_vm9, 1, %v1281_v35  ;;  %v1500_v52 = vadd.s32 %v328_v36, %v324_v32  ;;  %v580_v54 = vor.u32 %v579_v48, %v578_v40 }
  0x67   : > { %v333_v49 = vadd.s32 %v331_v46, %v329_v42  ;;  %vm586_vm11 = vcmp.lt.s32.totalorder %v1473_v61, 3  ;;  %v583_v56 = vor.u32 %v582_v27, %v581_v50  ;;  %vm585_vm12 = vcmp.lt.s32.totalorder %v1473_v61, 2 }
  0x68   : > { %v312_v51 = vadd.s32 %v311_v44, %v301_v20  ;;  %vm587_vm13 = vcmp.lt.s32.totalorder %v1473_v61, 4  ;;  %v592_v29 = vsel %vm584_vm10, %v1481_v34, %v1490_v43  ;;  %v601_v62 = vand.u32 65535, %v1466_v57 }
  0x69   : > { %v334_v55 = vadd.s32 %v333_v49, %v323_v30  ;;  %v593_v38 = vsel %vm587_vm13, %v580_v54, 920167782  ;;  %v602_v63 = vshrl.u32 %v1466_v57, 16  ;;  %v336_v3 = vmul.u32 %v1450_v16, %v1469_v58 }
  0x6a   : > { %v1505_v59 = vadd.s32 %v312_v51, %v303_v26  ;;  %v594_v60 = vsel %vm586_vm11, %v577_v47, %v593_v38  ;;  %v596_v5 = vsel %vm584_vm10, %v1490_v43, %v577_v47  ;;  %v597_v8 = vsel %vm587_vm13, %v583_v56, 1326507024 }
  0x6b   : > { %v335_v45 = vadd.s32 %v334_v55, %v325_v33  ;;  %v595_v4 = vsel %vm585_vm12, %v592_v29, %v594_v60  ;;  %v598_v11 = vsel %vm586_vm11, %v580_v54, %v597_v8  ;;  %v568_v37 = vshrl.u32 %v1275_v21, %v1463_v53 }
  0x6c   : > { %vm338_vm14 = vc.u32 %v1505_v59, %v1500_v52  ;;  %v625_v9 = vand.u32 65535, %v595_v4  ;;  %v626_v10 = vshrl.u32 %v595_v4, 16  ;;  %v599_v58 = vsel %vm585_vm12, %v596_v5, %v598_v11 }
  0x6d   : > { %v339_v6 = vadd.s32 1, %v335_v45  ;;  %v603_v13 = vand.u32 65535, %v599_v58  ;;  %v604_v14 = vshrl.u32 %v599_v58, 16  ;;  %v589_v40 = vsel %vm587_vm13, %v577_v47, 2102212464 }
  0x6e   : > { %v628_v15 = vmul.u32 %v626_v10, %v601_v62  ;;  %v627_v17 = vmul.u32 %v625_v9, %v601_v62  ;;  %v629_v18 = vmul.u32 %v625_v9, %v602_v63  ;;  %v630_v25 = vmul.u32 %v626_v10, %v602_v63 }
  0x6f   : > { %v340_v16 = vsel %vm338_vm14, %v339_v6, %v335_v45  ;;  %v605_v20 = vmul.u32 %v603_v13, %v601_v62  ;;  %v606_v22 = vmul.u32 %v604_v14, %v601_v62  ;;  %v607_v24 = vmul.u32 %v603_v13, %v602_v63 }
  0x70   : > { %v341_v12 = vadd.s32 %v340_v16, %v336_v3  ;;  %v631_v26 = vshll.u32 %v628_v15, 16  ;;  %v633_v28 = vshll.u32 %v629_v18, 16  ;;  %v608_v32 = vmul.u32 %v604_v14, %v602_v63 }
  0x71   : > { %v609_v23 = vshll.u32 %v606_v22, 16  ;;  %v611_v33 = vshll.u32 %v607_v24, 16  ;;  %v610_v46 = vshrl.u32 %v606_v22, 16  ;;  %v632_v50 = vshrl.u32 %v628_v15, 16 }
  0x72   : > { %v342_v19 = vadd.s32 536870912, %v341_v12  ;;  %vm635_vm15 = vc.u32 %v627_v17, %v631_v26  ;;  %v637_v36 = vadd.s32 %v631_v26, %v627_v17  ;;  %v612_v51 = vshrl.u32 %v607_v24, 16 }
  0x73   : > { %vm613_vm0 = vc.u32 %v605_v20, %v609_v23  ;;  %v615_v39 = vadd.s32 %v609_v23, %v605_v20  ;;  %v636_v42 = vsel %vm635_vm15, 1, %v1281_v35  ;;  %v588_v47 = vsel %vm584_vm10, %v568_v37, %v1481_v34 }
  0x74   : > { %v1532_v30 = vshrl.u32 %v342_v19, 30  ;;  %v614_v41 = vsel %vm613_vm0, 1, %v1281_v35  ;;  %vm639_vm1 = vc.u32 %v637_v36, %v633_v28  ;;  %v638_v27 = vadd.s32 %v636_v42, %v630_v25 }
  0x75   : > { %v616_v48 = vadd.s32 %v614_v41, %v608_v32  ;;  %vm617_vm2 = vc.u32 %v615_v39, %v611_v33  ;;  %v640_v21 = vsel %vm639_vm1, 1, %v1281_v35  ;;  %v590_v55 = vsel %vm586_vm11, %v1490_v43, %v589_v40 }
  0x76   : > { %v344_v31 = vshll.u32 %v1532_v30, 30  ;;  %v618_v49 = vsel %vm617_vm2, 1, %v1281_v35  ;;  %v634_v56 = vshrl.u32 %v629_v18, 16  ;;  %v642_v29 = vadd.s32 %v640_v21, %v638_v27 }
  0x77   : > { %v620_v54 = vadd.s32 %v618_v49, %v616_v48  ;;  %v641_v62 = vadd.s32 %v637_v36, %v633_v28  ;;  %v591_v35 = vsel %vm585_vm12, %v588_v47, %v590_v55  ;;  %v337_v34 = vadd.s32 %v1500_v52, %v1505_v59 }
  0x78   : > { %v345_v44 = vsub.s32 %v341_v12, %v344_v31  ;;  %v643_v63 = vadd.s32 %v642_v29, %v632_v50  ;;  %v645_v6 = vmul.u32 %v1466_v57, %v591_v35  ;;  %vm245_vm6 = vcmp.lt.s32.totalorder %v1438_v0, 0 }
  0x79   : > { %v621_v45 = vadd.s32 %v620_v54, %v610_v46  ;;  %vm1557_vm7 = vcmp.le.f32.partialorder %v243_v2, 0.7853982  ;;  %vm554_vm10 = vcmp.lt.s32.totalorder %v1440_v1, 0  ;;  %vm553_vm11 = vcmp.le.f32.partialorder %v552_v7, 0.7853982 }
  0x7a   : > { %vm346_vm3 = vcmp.lt.s32.totalorder %v345_v44, 0  ;;  %v347_v53 = vsub.s32 0, %v345_v44  ;;  %v644_v5 = vadd.s32 %v643_v63, %v634_v56  ;;  %vm695_vm2 = vweird.f32 %v1440_v1 }
  0x7b   : > { %v622_v3 = vadd.s32 %v621_v45, %v612_v51  ;;  %v367_v51 = vsub.s32 4, %v1532_v30 }
  0x7c   : > { %v348_v38 = vsel %vm346_vm3, %v347_v53, %v345_v44  ;;  %v648_v43 = vadd.s32 1, %v644_v5 }
  0x7d   : > { %v349_v60 = vclz %v348_v38  ;;  %vm647_vm5 = vc.u32 %v622_v3, %v641_v62  ;;  %v646_v31 = vadd.s32 %v641_v62, %v622_v3  ;;  %v368_v38 = vsel %vm245_vm6, %v367_v51, %v1532_v30 }
  0x7e   : > { %v649_v16 = vsel %vm647_vm5, %v648_v43, %v644_v5  ;;  %v370_v3 = vsel %vm1557_vm7, 0, %v368_v38 }
  0x7f   : > { %v1031_v4 = vadd.s32 4294967294, %v349_v60  ;;  %v650_v61 = vadd.s32 %v649_v16, %v645_v6 }
  0x81   : > { %vm1032_vm4 = vcmp.lt.s32.totalorder %v1031_v4, 0  ;;  %v651_v15 = vadd.s32 536870912, %v650_v61 }
  0x82   : > { %v352_v8 = vsel %vm1032_vm4, 0, %v1031_v4  ;;  %vm386_vm4 = vweird.f32 %v1438_v0 }
  0x83   : > { %v353_v9 = vsub.s32 32, %v352_v8  ;;  %v354_v10 = vshll.u32 %v345_v44, %v352_v8  ;;  %v357_v11 = vsub.s32 4294967266, %v352_v8  ;;  %v652_v19 = vshrl.u32 %v651_v15, 30 }
  0x84   : > { %v541_v8 = vadd.s32 3, %v370_v3 }
  0x85   : > { %v355_v58 = vshrl.u32 %v337_v34, %v353_v9  ;;  %v358_v12 = vadd.s32 127, %v357_v11  ;;  %v653_v59 = vshll.u32 %v652_v19, 30  ;;  %v676_v56 = vsub.s32 4, %v652_v19 }
  0x87   : > { %v356_v13 = vor.u32 %v355_v58, %v354_v10  ;;  %v359_v14 = vshll.u32 %v358_v12, 23  ;;  %v654_v57 = vsub.s32 %v650_v61, %v653_v59  ;;  %v677_v63 = vsel %vm554_vm10, %v676_v56, %v652_v19 }
  0x88   : > { %v679_v7 = vsel %vm553_vm11, 0, %v677_v63  ;;  %v387_v58 = vand.u32 3, %v370_v3 }
  0x89   : > { %v360_v17 = vor.u32 4788187, %v359_v14  ;;  %v363_v18 = vcvt.s32.f32 %v356_v13  ;;  %vm655_vm8 = vcmp.lt.s32.totalorder %v654_v57, 0  ;;  %v656_v26 = vsub.s32 0, %v654_v57 }
  0x8a   : > { %v850_v16 = vadd.s32 3, %v679_v7  ;;  %v542_v13 = vand.u32 3, %v541_v8  ;;  %vm388_vm12 = vcmp.lt.s32.totalorder %v387_v58, 2  ;;  %vm389_vm13 = vcmp.eq.s32.totalorder %v387_v58, 0 }
  0x8b   : > { %v361_v52 = vand.u32 2147483647, %v360_v17  ;;  %v657_v32 = vsel %vm655_vm8, %v656_v26, %v654_v57  ;;  %v696_v17 = vand.u32 3, %v679_v7  ;;  %vm392_vm14 = vcmp.eq.s32.totalorder %v387_v58, 2 }
  0x8c   : > { %v658_v33 = vclz %v657_v32  ;;  %vm543_vm15 = vcmp.lt.s32.totalorder %v542_v13, 2  ;;  %vm544_vm0 = vcmp.eq.s32.totalorder %v542_v13, 0  ;;  %vm547_vm1 = vcmp.eq.s32.totalorder %v542_v13, 2 }
  0x8d   : > { %v364_v20 = vmul.f32 %v363_v18, %v361_v52  ;;  %v851_v52 = vand.u32 3, %v850_v16  ;;  %vm697_vm3 = vcmp.lt.s32.totalorder %v696_v17, 2  ;;  %vm701_vm5 = vcmp.eq.s32.totalorder %v696_v17, 2 }
  0x8e   : > { %v1037_v25 = vadd.s32 4294967294, %v658_v33  ;;  %v865_v33 = vstv %s1576_s18  ;;  %s1214_s18 = scalar_lea.hbm %s1213_s11, 8 }
  0x8f   : > { %v365_v24 = vxor.u32 2147483648, %v364_v20  ;;  %vm852_vm8 = vcmp.lt.s32.totalorder %v851_v52, 2  ;;  %p1215_p1 = scmp.ne.s32.totalorder %s1213_s11, %s1214_s18 }
  0x90   : > { %vm1038_vm9 = vcmp.lt.s32.totalorder %v1037_v25, 0 }
  0x91   : > { %v366_v28 = vsel %vm245_vm6, %v365_v24, %v364_v20  ;;  %v661_v2 = vsel %vm1038_vm9, 0, %v1037_v25  ;;  %vm856_vm6 = vcmp.eq.s32.totalorder %v851_v52, 2  ;;  %vm853_vm9 = vcmp.eq.s32.totalorder %v851_v52, 0  ;;  %p1216_p4 = pnand %p1215_p1, %p1368_p3 }
  0x92   : > { %v369_v23 = vsel %vm1557_vm7, %v1438_v0, %v366_v28  ;;  %v662_v37 = vsub.s32 32, %v661_v2  ;;  %v663_v39 = vshll.u32 %v654_v57, %v661_v2  ;;  %v666_v40 = vsub.s32 4294967266, %v661_v2 }
  0x93   : > { %v371_v36 = vmul.f32 %v369_v23, %v369_v23  ;;  %vm698_vm7 = vcmp.eq.s32.totalorder %v696_v17, 0  ;;  %v873_v25 = vstv %s1584_s5  ;;  %p1217_p8 = pneg %p1216_p4 }
  0x94   : > { %v664_v42 = vshrl.u32 %v646_v31, %v662_v37  ;;  %v667_v44 = vadd.s32 127, %v666_v40  ;;  %v868_v37 = vstv %s1580_s25 }
  0x95   : > { %v379_v41 = vmul.f32 -0.00019511016, %v371_v36  ;;  %v372_v49 = vmul.f32 -0.001358992, %v371_v36 }
  0x96   : > { %v665_v46 = vor.u32 %v664_v42, %v663_v39  ;;  %v668_v48 = vshll.u32 %v667_v44, 23  ;;  %v878_v42 = vstv %s1586_s22 }
  0x97   : > { %v380_v50 = vadd.f32 0.008332121, %v379_v41  ;;  %v373_v54 = vadd.f32 0.041655596, %v372_v49  ;;  %v875_v41 = vstv %s1582_s26  ;;  %v888_v49 = vstv %s1590_s8  ;;  %s1218_s26 = scalar_lea.hbm %s1658_s3, 16 }
  0x98   : > { %v669_v27 = vor.u32 4788187, %v668_v48  ;;  %v672_v21 = vcvt.s32.f32 %v665_v46  ;;  %v883_v48 = vstv %s1588_s7  ;;  %p1220_p11 = scmp.lt.s32.totalorder %s1218_s26, %s1214_s18 }
  0x99   : > { %v381_v47 = vmul.f32 %v380_v50, %v371_v36  ;;  %v374_v45 = vmul.f32 %v373_v54, %v371_v36 }
  0x9a   : > { %v670_v53 = vand.u32 2147483647, %v669_v27  ;;  %p1221_p10 = por %p1220_p11, %p1219_p2 }
  0x9b   : > { %v382_v60 = vadd.f32 -0.16666654, %v381_v47  ;;  %v375_v5 = vadd.f32 -0.4999988, %v374_v45 }
  0x9c   : > { %v673_v55 = vmul.f32 %v672_v21, %v670_v53  ;;  %p1222_p12 = pnand %p1221_p10, %p1217_p8 }
  0x9d   : > { %v383_v34 = vmul.f32 %v382_v60, %v371_v36  ;;  %v376_v10 = vmul.f32 %v375_v5, %v371_v36 }
  0x9e   : > { %v674_v29 = vxor.u32 2147483648, %v673_v55 }
  0x9f   : > { %v384_v11 = vadd.f32 1.0, %v383_v34  ;;  %v377_v18 = vadd.f32 1.0, %v376_v10 }
  0xa0   : > { %v675_v62 = vsel %vm554_vm10, %v674_v29, %v673_v55  ;;  %v885_v55 = vstv %s1593_s27 }
  0xa1   : > { %v678_v35 = vsel %vm553_vm11, %v1440_v1, %v675_v62  ;;  %v385_v19 = vmul.f32 %v384_v11, %v369_v23  ;;  %v393_v26 = vxor.u32 2147483648, %v377_v18  ;;  %v863_v23 = vstv %s1578_s17 }
  0xa2   : > { %v680_v4 = vmul.f32 %v678_v35, %v678_v35 }
  0xa3   : > { %v390_v24 = vxor.u32 2147483648, %v385_v19  ;;  %v394_v40 = vsel %vm392_vm14, %v393_v26, %v385_v19  ;;  %v549_v27 = vsel %vm547_vm1, %v393_v26, %v385_v19 }
  0xa4   : > { %v681_v6 = vmul.f32 -0.001358992, %v680_v4  ;;  %v688_v43 = vmul.f32 -0.00019511016, %v680_v4 }
  0xa5   : > { %v391_v39 = vsel %vm389_vm13, %v377_v18, %v390_v24  ;;  %v546_v50 = vsel %vm544_vm0, %v377_v18, %v390_v24 }
  0xa6   : > { %v682_v30 = vadd.f32 0.041655596, %v681_v6  ;;  %v689_v9 = vadd.f32 0.008332121, %v688_v43  ;;  %v395_v51 = vsel %vm388_vm12, %v391_v39, %v394_v40  ;;  %v550_v60 = vsel %vm543_vm15, %v546_v50, %v549_v27 }
  0xa7   : > { %v551_v1 = vsel %vm386_vm4, nan, %v550_v60 }
  0xa8   : > { %v683_v12 = vmul.f32 %v682_v30, %v680_v4  ;;  %v690_v61 = vmul.f32 %v689_v9, %v680_v4 }
  0xaa   : > { %v684_v14 = vadd.f32 -0.4999988, %v683_v12  ;;  %v691_v15 = vadd.f32 -0.16666654, %v690_v61 }
  0xac   : > { %v685_v59 = vmul.f32 %v684_v14, %v680_v4  ;;  %v692_v20 = vmul.f32 %v691_v15, %v680_v4  ;;  %v396_v4 = vsel %vm386_vm4, nan, %v395_v51 }
  0xae   : > { %v686_v57 = vadd.f32 1.0, %v685_v59  ;;  %v693_v22 = vadd.f32 1.0, %v692_v20 }
  0xb0   : > { %v694_v28 = vmul.f32 %v693_v22, %v678_v35  ;;  %v702_v32 = vxor.u32 2147483648, %v686_v57 }
  0xb2   : > { %v699_v36 = vxor.u32 2147483648, %v694_v28  ;;  %v703_v31 = vsel %vm701_vm5, %v702_v32, %v694_v28  ;;  %v858_v2 = vsel %vm856_vm6, %v702_v32, %v694_v28 }
  0xb4   : > { %v700_v44 = vsel %vm698_vm7, %v686_v57, %v699_v36  ;;  %v855_v46 = vsel %vm853_vm9, %v686_v57, %v699_v36 }
  0xb5   : > { %v704_v21 = vsel %vm697_vm3, %v700_v44, %v703_v31  ;;  %v859_v53 = vsel %vm852_vm8, %v855_v46, %v858_v2 }
  0xb6   : > { %v705_v54 = vsel %vm695_vm2, nan, %v704_v21  ;;  %v860_v47 = vsel %vm695_vm2, nan, %v859_v53 }
  0xb7   : > { %v864_v56 = vmul.f32 %v863_v23, %v705_v54  ;;  %v869_v29 = vmul.f32 %v868_v37, %v860_v47  ;;  %v874_v38 = vmul.f32 %v873_v25, %v705_v54  ;;  %v879_v45 = vmul.f32 %v878_v42, %v860_v47 }
  0xb8   : > { %v884_v62 = vmul.f32 %v883_v48, %v705_v54  ;;  %v889_v63 = vmul.f32 %v888_v49, %v860_v47 }
  0xb9   : > { %v866_v35 = vadd.f32 %v865_v33, %v864_v56  ;;  %v876_v3 = vadd.f32 %v875_v41, %v874_v38 }
  0xba   : > { %v886_v5 = vadd.f32 %v885_v55, %v884_v62 }
  0xbb   : > { %v870_v34 = vadd.f32 %v869_v29, %v866_v35  ;;  %v880_v7 = vadd.f32 %v879_v45, %v876_v3 }
  0xbc   : > { %v890_v6 = vadd.f32 %v889_v63, %v886_v5 }
  0xbd   : > { %v891_v43 = vmul.f32 %v880_v7, %v396_v4 }
  0xbe   : > { %v893_v8 = vmul.f32 %v890_v6, %v551_v1 }
  0xbf   : > { %v892_v30 = vadd.f32 %v891_v43, %v870_v34 }
  0xc1   : > { %v894_v9 = vadd.f32 %v893_v8, %v892_v30 }
  0xc3   : > { %895 = vst [vmem:[%s240_s16] sm:$0xff] %v894_v9 }
  0xc4   : > { %1225 = shalt.err (!%p1222_p12)
}
  0xc5   : > { %1062 = dma.vmem_to_hbm [thread:$0]  (%p1368_p3), %s910_s9, 128, %s912_s0, %s897_s23  }
  0xc6 PF: > { %s923_s30 = sand.u32 1, %s1260_s12   ;;  %p1668_p0 = scmp.ge.s32.totalorder %s1272_s15, 2 }
  0xc7   : > { %s924_s22 = scalar_lea.sflag [#allocation4], %s923_s30 }
  0xc8   : > { %p1076_p9 = pnand %p1668_p0, %p1337_p6 }
  0xca   : > { %p1077_p13 = pneg %p1076_p9 }
  0xcc   : > { %1255 = dma.done.wait (%p1077_p13), %s924_s22, 128  }
  0xcd   : > { %1257 = vsyncadd (%p1077_p13), %s924_s22, 4294967168  ;;  %p20_p5 = scmp.ge.s32.totalorder %s1353_s24, 4   ;;  %s1669_s12 = smov %s1264_s13 }
  0xce   : > { %s1670_s13 = smov %s1268_s14  ;;  %s1671_s14 = smov %s1363_s28 }
  0xcf   : > { %s1672_s15 = smov %s1353_s24  ;;  %22 = sbr.rel (!%p20_p5) target bundleno = 10 (0xa), region = 95 }
  0xd4   :  { %930 = vsyncpa [#allocation3], 1 }
  0xd5   :  { %932 = vsyncpa [#allocation3 + $0x1], 1 }
  0xd6   :  { %933 = vsyncpa [#allocation8], 1 }
  0xd7   :  { %935 = vsyncpa [#allocation8 + $0x1], 1 }
  0xd8   :  { %936 = vsyncpa [#allocation4], 1 }
  0xd9   :  { %938 = vsyncpa [#allocation4 + $0x1], 1 }
  0xda   :  { %939 = vsyncpa [#allocation5], 1 }
  0xdb   :  { %941 = vsyncpa [#allocation5 + $0x1], 1 }

</bundles_post_ra>
